<compile_context>
chip_gen: v5e
topology: v5e:2x2
jax: 0.10.0
libtpu: 0.0.40
codegen_flags: <defaults>
</compile_context>

<pallas_src>
from functools import partial

import numpy as np
import jax
import jax.numpy as jnp
from jax.experimental import pallas as pl
from jax.experimental.pallas import tpu as pltpu


def _rope_kernel(pos_ref, sfreq_ref, q_ref, k_ref, oq_ref, ok_ref, *,
                 head_dim, interleaved):
    """Rotary embedding on a (row_tile, H*D) block of q and k.

    pos_ref:   (row_tile, 1) f32 -- position of each (b, s) row
    sfreq_ref: (1, H*D)      f32 -- signed inverse frequency per lane
    """
    pos = pos_ref[...]                       # (T, 1)
    sfreq = sfreq_ref[...]                   # (1, HD)
    ang = pos * sfreq                        # (T, HD) f32; sign folded into angle
    cos = jnp.cos(ang)                       # EUP (free slot in a mem-bound kernel)
    sin = jnp.sin(ang)                       # EUP; signed angle gives -sin / +sin

    tile, hd = q_ref.shape
    lane = jax.lax.broadcasted_iota(jnp.int32, (tile, hd), 1)
    if interleaved:
        # partner of lane 2i is lane 2i+1 (and vice versa) within each head
        first_of_pair = (lane % 2) == 0
        shift = 1
    else:
        # half-split: partner of dim d is d +/- D/2 within each head
        first_of_pair = (lane % head_dim) < (head_dim // 2)
        shift = head_dim // 2

    def rotate(x_ref, o_ref):
        x = x_ref[...].astype(jnp.float32)
        # partner[j] = x[j + shift] for the first element of a pair,
        #              x[j - shift] for the second (wrap lanes never selected)
        partner = jnp.where(first_of_pair,
                            jnp.roll(x, -shift, axis=-1),
                            jnp.roll(x, shift, axis=-1))
        o_ref[...] = (x * cos + partner * sin).astype(o_ref.dtype)

    rotate(q_ref, oq_ref)
    rotate(k_ref, ok_ref)


def st_rotary_embedding(q, k, positions, *, rope_theta=10000.0,
                        interleaved=True, row_tile=None):
    B, S, H, D = q.shape
    assert k.shape == (B, S, H, D)
    assert D % 2 == 0
    dtype = q.dtype
    HD = H * D
    N = B * S

    # Free reshapes of the contiguous [B,S,H,D] layout -> (rows, lanes) slabs.
    q2 = q.reshape(N, HD)
    k2 = k.reshape(N, HD)
    pos2 = positions.reshape(N, 1).astype(jnp.float32)

    # Tiny signed inverse-frequency lane pattern (f32, built once):
    #   interleaved: [-w0, +w0, -w1, +w1, ...] repeated per head
    #   half-split:  [-w0..-w_{D/2-1}, +w0..+w_{D/2-1}] repeated per head
    half = D // 2
    idx = jnp.arange(half, dtype=jnp.float32)
    inv_freq = rope_theta ** (-(2.0 * idx) / D)          # w_i = theta^(-2i/D)
    if interleaved:
        signed = jnp.stack([-inv_freq, inv_freq], axis=-1).reshape(D)
    else:
        signed = jnp.concatenate([-inv_freq, inv_freq])
    sfreq = jnp.tile(signed, H).reshape(1, HD).astype(jnp.float32)

    # Row tiling: big lane-dense blocks (~512 KiB per stream), rows multiple of 8.
    if row_tile is None:
        row_tile = ((512 * 1024) // (HD * 4)) // 8 * 8
        row_tile = max(8, min(2048, row_tile))
    row_tile = min(row_tile, ((N + 7) // 8) * 8)
    Np = pl.cdiv(N, row_tile) * row_tile
    if Np != N:
        # Only hit for ragged row counts; padded rows are computed and dropped.
        padn = Np - N
        q2 = jnp.pad(q2, ((0, padn), (0, 0)))
        k2 = jnp.pad(k2, ((0, padn), (0, 0)))
        pos2 = jnp.pad(pos2, ((0, padn), (0, 0)))

    row_spec = pl.BlockSpec((row_tile, HD), lambda i: (i, 0))
    kernel = partial(_rope_kernel, head_dim=D, interleaved=interleaved)
    oq, ok = pl.pallas_call(
        kernel,
        out_shape=(jax.ShapeDtypeStruct((Np, HD), dtype),
                   jax.ShapeDtypeStruct((Np, HD), dtype)),
        grid_spec=pltpu.PrefetchScalarGridSpec(
            num_scalar_prefetch=0,
            grid=(Np // row_tile,),
            in_specs=[pl.BlockSpec((row_tile, 1), lambda i: (i, 0)),  # positions
                      pl.BlockSpec((1, HD), lambda i: (0, 0)),        # signed freqs
                      row_spec, row_spec],                            # q, k
            out_specs=[row_spec, row_spec],
        ),
        compiler_params=pltpu.CompilerParams(
            dimension_semantics=("parallel",)),
    )(pos2, sfreq, q2, k2)

    if Np != N:
        oq = oq[:N]
        ok = ok[:N]
    return oq.reshape(B, S, H, D), ok.reshape(B, S, H, D)


def _reference(q, k, positions, rope_theta=10000.0):
    """Pure numpy interleaved-RoPE reference."""
    B, S, H, D = q.shape
    inv_freq = 1.0 / (rope_theta ** (np.arange(0, D, 2, dtype=np.float64) / D))
    ang = np.asarray(positions, np.float64)[..., None] * inv_freq       # [B,S,D/2]
    c = np.cos(ang)[:, :, None, :]
    s = np.sin(ang)[:, :, None, :]

    def rot(x):
        x = np.asarray(x, np.float64)
        xe = x[..., 0::2]
        xo = x[..., 1::2]
        oe = xe * c - xo * s
        oo = xo * c + xe * s
        out = np.empty_like(x)
        out[..., 0::2] = oe
        out[..., 1::2] = oo
        return out

    return rot(q), rot(k)


if __name__ == "__main__":
    # STRotaryEmbedding(head_dim=32, rope_theta=10000.0, interleaved=True)
    B, S, H, D = 2, 8, 4, 32
    rope_theta = 10000.0

    key = jax.random.PRNGKey(0)
    kq, kk = jax.random.split(key)
    q = jax.random.normal(kq, (B, S, H, D), dtype=jnp.float32)
    k = jax.random.normal(kk, (B, S, H, D), dtype=jnp.float32)
    positions = jnp.broadcast_to(jnp.arange(S, dtype=jnp.int32)[None, :], (B, S))

    q_rot, k_rot = st_rotary_embedding(q, k, positions, rope_theta=rope_theta,
                                       interleaved=True)
    jax.block_until_ready((q_rot, k_rot))

    q_ref, k_ref = _reference(q, k, positions, rope_theta=rope_theta)
    assert np.allclose(np.asarray(q_rot), q_ref, atol=1e-4, rtol=1e-4)
    assert np.allclose(np.asarray(k_rot), k_ref, atol=1e-4, rtol=1e-4)

    print("KERNEL_OK")
</pallas_src>

<mosaic_0001>
module attributes {stable_mosaic.version = 11 : i64} {
  func.func @_rope_kernel(%arg0: i32, %arg1: memref<16x1xf32, #tpu.memory_space<vmem>>, %arg2: memref<1x128xf32, #tpu.memory_space<vmem>>, %arg3: memref<16x128xf32, #tpu.memory_space<vmem>>, %arg4: memref<16x128xf32, #tpu.memory_space<vmem>>, %arg5: memref<16x128xf32, #tpu.memory_space<vmem>>, %arg6: memref<16x128xf32, #tpu.memory_space<vmem>>) attributes {dimension_semantics = [#tpu.dimension_semantics<parallel>], iteration_bounds = array<i64: 1>, scalar_prefetch = 0 : i64, scratch_operands = 0 : i64, tpu.core_type = #tpu.core_type<tc>, window_params = [{transform_indices = @transform_0, window_bounds = array<i64: 16, 1>}, {pipeline_mode = #tpu.pipeline_mode<synchronous>, transform_indices = @transform_1, window_bounds = array<i64: 1, 128>}, {transform_indices = @transform_2, window_bounds = array<i64: 16, 128>}, {transform_indices = @transform_3, window_bounds = array<i64: 16, 128>}, {transform_indices = @transform_4, window_bounds = array<i64: 16, 128>}, {transform_indices = @transform_5, window_bounds = array<i64: 16, 128>}]} {
    %c0 = arith.constant 0 : index
    %c0_0 = arith.constant 0 : index
    %0 = vector.load %arg1[%c0, %c0_0] : memref<16x1xf32, #tpu.memory_space<vmem>>, vector<16x1xf32>
    %c0_1 = arith.constant 0 : index
    %c0_2 = arith.constant 0 : index
    %1 = vector.load %arg2[%c0_1, %c0_2] : memref<1x128xf32, #tpu.memory_space<vmem>>, vector<1x128xf32>
    %2 = vector.broadcast %0 : vector<16x1xf32> to vector<16x128xf32>
    %3 = vector.broadcast %1 : vector<1x128xf32> to vector<16x128xf32>
    %4 = arith.mulf %2, %3 : vector<16x128xf32>
    %5 = math.cos %4 : vector<16x128xf32>
    %6 = math.sin %4 : vector<16x128xf32>
    %7 = tpu.iota {dimensions = array<i32: 1>} : vector<16x128xi32>
    %c2_i32 = arith.constant 2 : i32
    %c0_i32 = arith.constant 0 : i32
    %8 = arith.cmpi eq, %c2_i32, %c0_i32 : i32
    %c1_i32 = arith.constant 1 : i32
    %9 = arith.select %8, %c1_i32, %c2_i32 : i32
    %10 = vector.broadcast %9 : i32 to vector<16x128xi32>
    %11 = arith.remsi %7, %10 : vector<16x128xi32>
    %c0_i32_3 = arith.constant 0 : i32
    %12 = vector.broadcast %c0_i32_3 : i32 to vector<16x128xi32>
    %13 = arith.cmpi ne, %11, %12 : vector<16x128xi32>
    %c0_i32_4 = arith.constant 0 : i32
    %14 = vector.broadcast %c0_i32_4 : i32 to vector<16x128xi32>
    %15 = arith.cmpi slt, %11, %14 : vector<16x128xi32>
    %c0_i32_5 = arith.constant 0 : i32
    %16 = arith.cmpi slt, %9, %c0_i32_5 : i32
    %17 = vector.broadcast %16 : i1 to vector<16x128xi1>
    %18 = vector.broadcast %17 : vector<16x128xi1> to vector<16x128xi1>
    %19 = arith.xori %15, %18 : vector<16x128xi1>
    %20 = arith.andi %19, %13 : vector<16x128xi1>
    %21 = vector.broadcast %9 : i32 to vector<16x128xi32>
    %22 = arith.addi %11, %21 : vector<16x128xi32>
    %23 = arith.select %20, %22, %11 : vector<16x128xi1>, vector<16x128xi32>
    %c0_i32_6 = arith.constant 0 : i32
    %24 = vector.broadcast %c0_i32_6 : i32 to vector<16x128xi32>
    %25 = arith.cmpi eq, %23, %24 : vector<16x128xi32>
    %c0_7 = arith.constant 0 : index
    %c0_8 = arith.constant 0 : index
    %26 = vector.load %arg3[%c0_7, %c0_8] : memref<16x128xf32, #tpu.memory_space<vmem>>, vector<16x128xf32>
    %27 = vector.extract_strided_slice %26 {offsets = [0, 1], sizes = [16, 127], strides = [1, 1]} : vector<16x128xf32> to vector<16x127xf32>
    %28 = vector.extract_strided_slice %26 {offsets = [0, 0], sizes = [16, 1], strides = [1, 1]} : vector<16x128xf32> to vector<16x1xf32>
    %29 = tpu.concatenate %27, %28 in 1 : vector<16x127xf32>, vector<16x1xf32> -> vector<16x128xf32>
    %30 = vector.extract_strided_slice %26 {offsets = [0, 127], sizes = [16, 1], strides = [1, 1]} : vector<16x128xf32> to vector<16x1xf32>
    %31 = vector.extract_strided_slice %26 {offsets = [0, 0], sizes = [16, 127], strides = [1, 1]} : vector<16x128xf32> to vector<16x127xf32>
    %32 = tpu.concatenate %30, %31 in 1 : vector<16x1xf32>, vector<16x127xf32> -> vector<16x128xf32>
    %33 = arith.select %25, %29, %32 : vector<16x128xi1>, vector<16x128xf32>
    %34 = arith.mulf %26, %5 : vector<16x128xf32>
    %35 = arith.mulf %33, %6 : vector<16x128xf32>
    %36 = arith.addf %34, %35 : vector<16x128xf32>
    %c0_9 = arith.constant 0 : index
    %c0_10 = arith.constant 0 : index
    %37 = vector.load %arg5[%c0_9, %c0_10] : memref<16x128xf32, #tpu.memory_space<vmem>>, vector<16x128xf32>
    tpu.vector_store %arg5[%c0_9, %c0_10], %36 {strides = array<i32>} : memref<16x128xf32, #tpu.memory_space<vmem>>, vector<16x128xf32>,
    %c0_11 = arith.constant 0 : index
    %c0_12 = arith.constant 0 : index
    %38 = vector.load %arg4[%c0_11, %c0_12] : memref<16x128xf32, #tpu.memory_space<vmem>>, vector<16x128xf32>
    %39 = vector.extract_strided_slice %38 {offsets = [0, 1], sizes = [16, 127], strides = [1, 1]} : vector<16x128xf32> to vector<16x127xf32>
    %40 = vector.extract_strided_slice %38 {offsets = [0, 0], sizes = [16, 1], strides = [1, 1]} : vector<16x128xf32> to vector<16x1xf32>
    %41 = tpu.concatenate %39, %40 in 1 : vector<16x127xf32>, vector<16x1xf32> -> vector<16x128xf32>
    %42 = vector.extract_strided_slice %38 {offsets = [0, 127], sizes = [16, 1], strides = [1, 1]} : vector<16x128xf32> to vector<16x1xf32>
    %43 = vector.extract_strided_slice %38 {offsets = [0, 0], sizes = [16, 127], strides = [1, 1]} : vector<16x128xf32> to vector<16x127xf32>
    %44 = tpu.concatenate %42, %43 in 1 : vector<16x1xf32>, vector<16x127xf32> -> vector<16x128xf32>
    %45 = arith.select %25, %41, %44 : vector<16x128xi1>, vector<16x128xf32>
    %46 = arith.mulf %38, %5 : vector<16x128xf32>
    %47 = arith.mulf %45, %6 : vector<16x128xf32>
    %48 = arith.addf %46, %47 : vector<16x128xf32>
    %c0_13 = arith.constant 0 : index
    %c0_14 = arith.constant 0 : index
    %49 = vector.load %arg6[%c0_13, %c0_14] : memref<16x128xf32, #tpu.memory_space<vmem>>, vector<16x128xf32>
    tpu.vector_store %arg6[%c0_13, %c0_14], %48 {strides = array<i32>} : memref<16x128xf32, #tpu.memory_space<vmem>>, vector<16x128xf32>,
    return
  }
  func.func @transform_0(%arg0: i32) -> (i32, i32) {
    %c0_i32 = arith.constant 0 : i32
    %c0_i32_0 = arith.constant 0 : i32
    return %arg0, %c0_i32 : i32, i32
  }
  func.func @transform_1(%arg0: i32) -> (i32, i32) {
    %c0_i32 = arith.constant 0 : i32
    %c0_i32_0 = arith.constant 0 : i32
    %c0_i32_1 = arith.constant 0 : i32
    return %c0_i32, %c0_i32_0 : i32, i32
  }
  func.func @transform_2(%arg0: i32) -> (i32, i32) {
    %c0_i32 = arith.constant 0 : i32
    %c0_i32_0 = arith.constant 0 : i32
    return %arg0, %c0_i32 : i32, i32
  }
  func.func @transform_3(%arg0: i32) -> (i32, i32) {
    %c0_i32 = arith.constant 0 : i32
    %c0_i32_0 = arith.constant 0 : i32
    return %arg0, %c0_i32 : i32, i32
  }
  func.func @transform_4(%arg0: i32) -> (i32, i32) {
    %c0_i32 = arith.constant 0 : i32
    %c0_i32_0 = arith.constant 0 : i32
    return %arg0, %c0_i32 : i32, i32
  }
  func.func @transform_5(%arg0: i32) -> (i32, i32) {
    %c0_i32 = arith.constant 0 : i32
    %c0_i32_0 = arith.constant 0 : i32
    return %arg0, %c0_i32 : i32, i32
  }
}

</mosaic_0001>

<bundles_post_ra>
// kernel: tpu_custom_call.1
= control target key start
LH: loop header
LB: loop body
LE: loop exit
PB: predicated region body
PF: predicated region fallthrough
CT: control target
= control target key end

     0   :  { %11 = vsyncpa [#allocation3], 0  ;;  %s1182_s0 = inlined_call_operand.vmem [shape: f32[16,1], index: 0, kind: input, shape index: {}]   ;;  %s1183_s1 = inlined_call_operand.vmem [shape: f32[1,128], index: 1, kind: input, shape index: {}]   ;;  %s1184_s2 = inlined_call_operand.vmem [shape: f32[16,128], index: 2, kind: input, shape index: {}]   ;;  %s1185_s3 = inlined_call_operand.hbm [shape: f32[16,128], index: 3, kind: input, shape index: {}]   ;;  %s1186_s4 = inlined_call_operand.hbm [shape: f32[16,128], index: 4, kind: output, shape index: {0}]   ;;  %s1187_s5 = inlined_call_operand.hbm [shape: f32[16,128], index: 5, kind: output, shape index: {1}]  }
   0x1   :  { %12 = vsyncpa [#allocation4], 0 }
   0x2   :  { %13 = vsyncpa [#allocation7], 0  ;;  %s24_s20 = sshll.u32 %s1185_s3, 4  ;;  %s883_s21 = smov [#allocation2]   ;;  %s25_s20 = int_to_ptr.hbm [resolvable:$true] %s24_s20 }
   0x3   :  { %s26_s22 = sshll.u32 %s883_s21, 4  ;;  %s884_s23 = smov 128   ;;  %s27_s22 = int_to_ptr.vmem [resolvable:$true] %s26_s22 }
   0x4   :  { %s885_s24 = smov 8  }
   0x5   :  { %32 = dma.hbm_to_vmem [thread:$0]  %s25_s20, 256, %s27_s22, [#allocation3], %s884_s23, %s884_s23, %s885_s24  }
   0x6   :  { %877 = dma.done.wait [#allocation3], 256  }
   0x7   :  { %878 = vsyncadd [#allocation3], 4294967040  ;;  %v886_v0 = vmov 0   ;;  %v37_v1 = vld [vmem:[%s1182_s0] sm:$0xff]  ;;  %s887_s28 = smov 127   ;;  %s888_s29 = smov 1  }
   0x8   :  { %803 = vset.pattern.permute.xlu0 %v886_v0  ;;  %v940_v2 = vld [vmem:[%s1184_s2] sm:$0xff]  ;;  %v38_v3 = vld [vmem:[%s1182_s0 + $0x8] sm:$0xff]  ;;  %v889_v26 = vmov 683565275   ;;  %v890_v28 = vmov 2475754826  }
   0x9   :  { %42 = vperm.xlu0 %803, %v37_v1   ;;  %692 = vrot.lane.b32.xlu1 %v940_v2, %s887_s28  ;;  %v950_v4 = vld [vmem:[%s1184_s2 + $0x8] sm:$0xff]  ;;  %v954_v5 = vld [vmem:[#allocation2] sm:$0xff]  ;;  %v891_v32 = vmov 2131351028   ;;  %v892_v35 = vmov 2102212464  }
   0xa   :  { %698 = vrot.lane.b32.xlu2 %v940_v2, %s888_s29  ;;  %v956_v6 = vld [vmem:[#allocation2 + $0x8] sm:$0xff]  ;;  %v804_v7 = vld [vmem:[%s1183_s1] ss:$0 sm:$0xff]  ;;  %v893_v38 = vmov 920167782   ;;  %s895_s1 = smov [#allocation5]  }
   0xb   :  { %v894_v41 = vmov 1326507024   ;;  %s744_s9 = sshll.u32 %s895_s1, 4  ;;  %s746_s12 = sshll.u32 %s1186_s4, 4  ;;  %s745_s9 = int_to_ptr.vmem [resolvable:$true] %s744_s9  ;;  %s747_s12 = int_to_ptr.hbm [resolvable:$true] %s746_s12 }
   0xc   :  { %s896_s13 = smov [#allocation6]   ;;  %s759_s17 = sshll.u32 %s1187_s5, 4  ;;  %s760_s17 = int_to_ptr.hbm [resolvable:$true] %s759_s17 }
   0xd   :  { %s757_s14 = sshll.u32 %s896_s13, 4  ;;  %s758_s14 = int_to_ptr.vmem [resolvable:$true] %s757_s14 }
  0x11   :  { %47 = vperm.xlu0 %803, %v38_v3   ;;  %694 = vrot.lane.b32.xlu1 %v950_v4, %s887_s28 }
  0x12   :  { %700 = vrot.lane.b32.xlu2 %v950_v4, %s888_s29 }
  0x19   :  { %718 = vrot.lane.b32.xlu0 %v954_v5, %s887_s28  ;;  %720 = vrot.lane.b32.xlu1 %v956_v6, %s887_s28 }
  0x1a   :  { %724 = vrot.lane.b32.xlu2 %v954_v5, %s888_s29 }
  0x21   :  { %726 = vrot.lane.b32.xlu0 %v956_v6, %s888_s29 }
  0x7b   :  { %v43_v8 = vpop.permute.xlu0 %42 }
  0x7c   :  { %v965_v9 = vmul.f32 %v804_v7, %v43_v8 }
  0x7e   :  { %v58_v10 = vand.u32 2139095040, %v965_v9  ;;  %v55_v12 = vand.u32 2147483647, %v965_v9 }
  0x80   :  { %v59_v11 = vshrl.u32 %v58_v10, 23  ;;  %v62_v17 = vand.u32 8388607, %v55_v12 }
  0x82   :  { %v777_v13 = vadd.s32 4294967169, %v59_v11  ;;  %v63_v22 = vor.u32 8388608, %v62_v17 }
  0x83   :  { %v48_v14 = vpop.permute.xlu0 %47 }
  0x84   :  { %v65_v15 = vadd.s32 1, %v777_v13  ;;  %v969_v16 = vmul.f32 %v804_v7, %v48_v14  ;;  %v990_v50 = vshll.u32 %v63_v22, 8 }
  0x86   :  { %vm66_vm0 = vcmp.gt.s32.totalorder %v65_v15, 0  ;;  %v209_v19 = vand.u32 2147483647, %v969_v16  ;;  %v212_v20 = vand.u32 2139095040, %v969_v16  ;;  %v1008_v59 = vand.u32 65535, %v990_v50 }
  0x87   :  { %v67_v18 = vsel %vm66_vm0, %v65_v15, 0  ;;  %v105_v7 = vshrl.u32 %v990_v50, 16 }
  0x88   :  { %v69_v21 = vand.u32 31, %v67_v18  ;;  %v213_v24 = vshrl.u32 %v212_v20, 23  ;;  %v975_v25 = vshrl.u32 %v67_v18, 5  ;;  %v216_v30 = vand.u32 8388607, %v209_v19 }
  0x8a   :  { %v70_v23 = vsub.s32 32, %v69_v21  ;;  %v72_v27 = vshll.u32 %v889_v26, %v69_v21  ;;  %v75_v29 = vshll.u32 %v890_v28, %v69_v21  ;;  %v78_v34 = vshll.u32 %v891_v32, %v69_v21 }
  0x8b   :  { %v81_v37 = vshll.u32 %v892_v35, %v69_v21  ;;  %v84_v40 = vshll.u32 %v893_v38, %v69_v21  ;;  %v780_v45 = vadd.s32 4294967169, %v213_v24  ;;  %vm87_vm1 = vcmp.lt.s32.totalorder %v975_v25, 1 }
  0x8c   :  { %v73_v31 = vshrl.u32 %v890_v28, %v70_v23  ;;  %v76_v33 = vshrl.u32 %v891_v32, %v70_v23  ;;  %v79_v36 = vshrl.u32 %v892_v35, %v70_v23  ;;  %v82_v39 = vshrl.u32 %v893_v38, %v70_v23 }
  0x8d   :  { %v85_v42 = vshrl.u32 %v894_v41, %v70_v23  ;;  %vm89_vm2 = vcmp.lt.s32.totalorder %v975_v25, 3  ;;  %vm90_vm3 = vcmp.lt.s32.totalorder %v975_v25, 4  ;;  %v217_v53 = vor.u32 8388608, %v216_v30 }
  0x8e   :  { %v980_v43 = vor.u32 %v76_v33, %v75_v29  ;;  %v80_v44 = vor.u32 %v79_v36, %v78_v34  ;;  %v982_v46 = vor.u32 %v73_v31, %v72_v27  ;;  %v83_v47 = vor.u32 %v82_v39, %v81_v37 }
  0x8f   :  { %v86_v48 = vor.u32 %v85_v42, %v84_v40  ;;  %v219_v54 = vadd.s32 1, %v780_v45  ;;  %vm88_vm4 = vcmp.lt.s32.totalorder %v975_v25, 2  ;;  %v1010_v63 = vshll.u32 %v217_v53, 8 }
  0x90   :  { %v99_v49 = vsel %vm87_vm1, %v980_v43, %v80_v44  ;;  %v96_v51 = vsel %vm90_vm3, %v83_v47, 920167782  ;;  %v95_v56 = vsel %vm87_vm1, %v982_v46, %v980_v43  ;;  %v71_v8 = vshrl.u32 %v889_v26, %v70_v23 }
  0x91   :  { %v100_v52 = vsel %vm90_vm3, %v86_v48, 1326507024  ;;  %v97_v57 = vsel %vm89_vm2, %v80_v44, %v96_v51  ;;  %vm220_vm5 = vcmp.gt.s32.totalorder %v219_v54, 0  ;;  %v92_v14 = vsel %vm90_vm3, %v80_v44, 2102212464 }
  0x92   :  { %v101_v55 = vsel %vm89_vm2, %v83_v47, %v100_v52  ;;  %v221_v62 = vsel %vm220_vm5, %v219_v54, 0  ;;  %v98_v1 = vsel %vm88_vm4, %v95_v56, %v97_v57  ;;  %v1024_v18 = vand.u32 65535, %v1010_v63 }
  0x93   :  { %v102_v58 = vsel %vm88_vm4, %v99_v49, %v101_v55  ;;  %v223_v13 = vand.u32 31, %v221_v62  ;;  %v128_v15 = vand.u32 65535, %v98_v1  ;;  %v129_v17 = vshrl.u32 %v98_v1, 16 }
  0x94   :  { %v106_v60 = vand.u32 65535, %v102_v58  ;;  %v107_v61 = vshrl.u32 %v102_v58, 16  ;;  %v1031_v24 = vshrl.u32 %v221_v62, 5  ;;  %v259_v57 = vshrl.u32 %v1010_v63, 16 }
  0x95   :  { %v1028_v22 = vsub.s32 32, %v223_v13  ;;  %v226_v27 = vshll.u32 %v889_v26, %v223_v13  ;;  %v229_v29 = vshll.u32 %v890_v28, %v223_v13  ;;  %v232_v33 = vshll.u32 %v891_v32, %v223_v13 }
  0x96   :  { %v1015_v3 = vmul.u32 %v107_v61, %v1008_v59  ;;  %v108_v10 = vmul.u32 %v106_v60, %v1008_v59  ;;  %v1026_v20 = vmul.u32 %v106_v60, %v105_v7  ;;  %v111_v21 = vmul.u32 %v107_v61, %v105_v7 }
  0x97   :  { %v227_v30 = vshrl.u32 %v890_v28, %v1028_v22  ;;  %v230_v31 = vshrl.u32 %v891_v32, %v1028_v22  ;;  %v235_v34 = vshll.u32 %v892_v35, %v223_v13  ;;  %v233_v36 = vshrl.u32 %v892_v35, %v1028_v22 }
  0x98   :  { %v112_v11 = vshll.u32 %v1015_v3, 16  ;;  %v236_v37 = vshrl.u32 %v893_v38, %v1028_v22  ;;  %v238_v39 = vshll.u32 %v893_v38, %v223_v13  ;;  %v239_v40 = vshrl.u32 %v894_v41, %v1028_v22 }
  0x99   :  { %v1040_v44 = vmul.u32 %v129_v17, %v1008_v59  ;;  %v1042_v45 = vor.u32 %v227_v30, %v226_v27  ;;  %v1044_v47 = vor.u32 %v230_v31, %v229_v29  ;;  %v1046_v28 = vor.u32 %v233_v36, %v232_v33 }
  0x9a   :  { %vm116_vm6 = vc.u32 %v108_v10, %v112_v11  ;;  %v118_v42 = vadd.s32 %v112_v11, %v108_v10  ;;  %v237_v48 = vor.u32 %v236_v37, %v235_v34  ;;  %v240_v32 = vor.u32 %v239_v40, %v238_v39 }
  0x9b   :  { %v117_v23 = vsel %vm116_vm6, 1, %v886_v0  ;;  %vm241_vm7 = vcmp.lt.s32.totalorder %v1031_v24, 1  ;;  %v114_v35 = vshll.u32 %v1026_v20, 16  ;;  %vm244_vm8 = vcmp.lt.s32.totalorder %v1031_v24, 4 }
  0x9c   :  { %v119_v49 = vadd.s32 %v117_v23, %v111_v21  ;;  %v249_v38 = vsel %vm241_vm7, %v1042_v45, %v1044_v47  ;;  %vm243_vm9 = vcmp.lt.s32.totalorder %v1031_v24, 3  ;;  %v250_v41 = vsel %vm244_vm8, %v237_v48, 920167782 }
  0x9d   :  { %v253_v51 = vsel %vm241_vm7, %v1044_v47, %v1046_v28  ;;  %v254_v52 = vsel %vm244_vm8, %v240_v32, 1326507024  ;;  %vm242_vm10 = vcmp.lt.s32.totalorder %v1031_v24, 2  ;;  %v251_v53 = vsel %vm243_vm9, %v1046_v28, %v250_v41 }
  0x9e   :  { %v255_v54 = vsel %vm243_vm9, %v237_v48, %v254_v52  ;;  %vm120_vm11 = vc.u32 %v118_v42, %v114_v35  ;;  %v252_v55 = vsel %vm242_vm10, %v249_v38, %v251_v53  ;;  %v132_v60 = vmul.u32 %v128_v15, %v105_v7 }
  0x9f   :  { %v256_v56 = vsel %vm242_vm10, %v253_v51, %v255_v54  ;;  %v121_v58 = vsel %vm120_vm11, 1, %v886_v0  ;;  %v283_v1 = vshrl.u32 %v252_v55, 16  ;;  %v91_v10 = vsel %vm87_vm1, %v71_v8, %v982_v46 }
  0xa0   :  { %v260_v61 = vand.u32 65535, %v256_v56  ;;  %v261_v62 = vshrl.u32 %v256_v56, 16  ;;  %v93_v11 = vsel %vm89_vm2, %v980_v43, %v92_v14  ;;  %v130_v13 = vmul.u32 %v128_v15, %v1008_v59 }
  0xa1   :  { %v134_v21 = vshll.u32 %v1040_v44, 16  ;;  %v133_v23 = vmul.u32 %v129_v17, %v105_v7  ;;  %v123_v30 = vadd.s32 %v121_v58, %v119_v49  ;;  %v282_v31 = vand.u32 65535, %v252_v55 }
  0xa2   :  { %v263_v27 = vmul.u32 %v261_v62, %v1024_v18  ;;  %v264_v29 = vmul.u32 %v260_v61, %v259_v57  ;;  %v113_v33 = vshrl.u32 %v1015_v3, 16  ;;  %v115_v34 = vshrl.u32 %v1026_v20, 16 }
  0xa3   :  { %v135_v46 = vshrl.u32 %v1040_v44, 16  ;;  %v262_v8 = vmul.u32 %v260_v61, %v1024_v18  ;;  %v285_v43 = vmul.u32 %v283_v1, %v1024_v18  ;;  %v136_v59 = vshll.u32 %v132_v60, 16 }
  0xa4   :  { %v266_v36 = vshll.u32 %v263_v27, 16  ;;  %v265_v14 = vmul.u32 %v261_v62, %v259_v57  ;;  %v268_v15 = vshll.u32 %v264_v29, 16  ;;  %vm138_vm12 = vc.u32 %v130_v13, %v134_v21 }
  0xa5   :  { %v140_v7 = vadd.s32 %v134_v21, %v130_v13  ;;  %v124_v37 = vadd.s32 %v123_v30, %v113_v33  ;;  %v139_v39 = vsel %vm138_vm12, 1, %v886_v0  ;;  %v286_v20 = vmul.u32 %v282_v31, %v259_v57 }
  0xa6   :  { %vm270_vm13 = vc.u32 %v262_v8, %v266_v36  ;;  %v272_v17 = vadd.s32 %v266_v36, %v262_v8  ;;  %v141_v40 = vadd.s32 %v139_v39, %v133_v23  ;;  %v288_v48 = vshll.u32 %v285_v43, 16 }
  0xa7   :  { %v271_v3 = vsel %vm270_vm13, 1, %v886_v0  ;;  %vm142_vm14 = vc.u32 %v140_v7, %v136_v59  ;;  %v284_v32 = vmul.u32 %v282_v31, %v1024_v18  ;;  %v287_v35 = vmul.u32 %v283_v1, %v259_v57 }
  0xa8   :  { %v273_v42 = vadd.s32 %v271_v3, %v265_v14  ;;  %v143_v44 = vsel %vm142_vm14, 1, %v886_v0  ;;  %vm274_vm15 = vc.u32 %v272_v17, %v268_v15  ;;  %v125_v41 = vadd.s32 %v124_v37, %v115_v34 }
  0xa9   :  { %v145_v49 = vadd.s32 %v143_v44, %v141_v40  ;;  %v275_v38 = vsel %vm274_vm15, 1, %v886_v0  ;;  %v137_v51 = vshrl.u32 %v132_v60, 16  ;;  %v267_v52 = vshrl.u32 %v263_v27, 16 }
  0xaa   :  { %v277_v53 = vadd.s32 %v275_v38, %v273_v42  ;;  %v290_v55 = vshll.u32 %v286_v20, 16  ;;  %vm292_vm0 = vc.u32 %v284_v32, %v288_v48  ;;  %v294_v56 = vadd.s32 %v288_v48, %v284_v32 }
  0xab   :  { %v146_v54 = vadd.s32 %v145_v49, %v135_v46  ;;  %v94_v58 = vsel %vm88_vm4, %v91_v10, %v93_v11  ;;  %v144_v61 = vadd.s32 %v140_v7, %v136_v59  ;;  %v293_v13 = vsel %vm292_vm0, 1, %v886_v0 }
  0xac   :  { %v278_v62 = vadd.s32 %v277_v53, %v267_v52  ;;  %v246_v18 = vsel %vm244_vm8, %v1046_v28, 2102212464  ;;  %v295_v1 = vadd.s32 %v293_v13, %v287_v35  ;;  %vm296_vm1 = vc.u32 %v294_v56, %v290_v55 }
  0xad   :  { %v147_v57 = vadd.s32 %v146_v54, %v137_v51  ;;  %v225_v60 = vshrl.u32 %v889_v26, %v1028_v22  ;;  %vm150_vm2 = vc.u32 %v125_v41, %v144_v61  ;;  %v269_v21 = vshrl.u32 %v264_v29, 16 }
  0xae   :  { %v297_v23 = vsel %vm296_vm1, 1, %v886_v0  ;;  %v289_v10 = vshrl.u32 %v285_v43, 16  ;;  %v148_v27 = vmul.u32 %v990_v50, %v94_v58  ;;  %v247_v28 = vsel %vm243_vm9, %v1044_v47, %v246_v18 }
  0xaf   :  { %v151_v25 = vadd.s32 1, %v147_v57  ;;  %v299_v11 = vadd.s32 %v297_v23, %v295_v1  ;;  %v245_v30 = vsel %vm241_vm7, %v225_v60, %v1042_v45  ;;  %v279_v31 = vadd.s32 %v278_v62, %v269_v21  ;;  %v1117_v21 = vpop.permute.xlu2 %698 }
  0xb0   :  { %v291_v26 = vshrl.u32 %v286_v20, 16  ;;  %v298_v34 = vadd.s32 %v294_v56, %v290_v55  ;;  %v248_v0 = vsel %vm242_vm10, %v245_v30, %v247_v28  ;;  %v149_v42 = vadd.s32 %v144_v61, %v125_v41 }
  0xb1   :  { %v152_v33 = vsel %vm150_vm2, %v151_v25, %v147_v57  ;;  %v300_v22 = vadd.s32 %v299_v11, %v289_v10  ;;  %v302_v36 = vmul.u32 %v1010_v63, %v248_v0  ;;  %vm57_vm8 = vcmp.lt.s32.totalorder %v965_v9, 0 }
  0xb2   :  { %v153_v29 = vadd.s32 %v152_v33, %v148_v27  ;;  %vm304_vm3 = vc.u32 %v279_v31, %v298_v34  ;;  %v303_v56 = vadd.s32 %v298_v34, %v279_v31  ;;  %vm56_vm9 = vcmp.le.f32.partialorder %v55_v12, 0.7853982 }
  0xb3   :  { %v301_v46 = vadd.s32 %v300_v22, %v291_v26  ;;  %v673_v22 = vlaneseq  ;;  %vm211_vm10 = vcmp.lt.s32.totalorder %v969_v16, 0  ;;  %vm1131_vm11 = vcmp.le.f32.partialorder %v209_v19, 0.7853982 }
  0xb4   :  { %v154_v8 = vadd.s32 536870912, %v153_v29  ;;  %vm198_vm13 = vweird.f32 %v965_v9 }
  0xb5   :  { %v305_v50 = vadd.s32 1, %v301_v46  ;;  %v674_v12 = vand.u32 127, %v673_v22 }
  0xb6   :  { %v155_v45 = vshrl.u32 %v154_v8, 30  ;;  %v1123_v8 = vpop.permute.xlu1 %692 }
  0xb7   :  { %v306_v43 = vsel %vm304_vm3, %v305_v50, %v301_v46 }
  0xb8   :  { %v156_v59 = vshll.u32 %v155_v45, 30  ;;  %v307_v14 = vadd.s32 %v306_v43, %v302_v36  ;;  %v179_v11 = vsub.s32 4, %v155_v45 }
  0xba   :  { %v157_v47 = vsub.s32 %v153_v29, %v156_v59  ;;  %v308_v15 = vadd.s32 536870912, %v307_v14  ;;  %v180_v29 = vsel %vm57_vm8, %v179_v11, %v155_v45 }
  0xbb   :  { %v182_v50 = vsel %vm56_vm9, 0, %v180_v29 }
  0xbc   :  { %vm158_vm4 = vcmp.lt.s32.totalorder %v157_v47, 0  ;;  %v159_v7 = vsub.s32 0, %v157_v47  ;;  %v1114_v17 = vshrl.u32 %v308_v15, 30  ;;  %v199_v19 = vand.u32 3, %v182_v50 }
  0xbe   :  { %v160_v37 = vsel %vm158_vm4, %v159_v7, %v157_v47  ;;  %v310_v24 = vshll.u32 %v1114_v17, 30  ;;  %vm200_vm14 = vcmp.lt.s32.totalorder %v199_v19, 2  ;;  %vm201_vm15 = vcmp.eq.s32.totalorder %v199_v19, 0 }
  0xbf   :  { %v161_v39 = vclz %v160_v37  ;;  %vm204_vm0 = vcmp.eq.s32.totalorder %v199_v19, 2 }
  0xc0   :  { %v311_v20 = vsub.s32 %v307_v14, %v310_v24  ;;  %v333_v14 = vsub.s32 4, %v1114_v17 }
  0xc1   :  { %v778_v3 = vadd.s32 4294967294, %v161_v39  ;;  %v507_v39 = vadd.s32 3, %v182_v50 }
  0xc2   :  { %vm312_vm6 = vcmp.lt.s32.totalorder %v311_v20, 0  ;;  %v313_v63 = vsub.s32 0, %v311_v20 }
  0xc3   :  { %vm779_vm5 = vcmp.lt.s32.totalorder %v778_v3, 0 }
  0xc4   :  { %v164_v40 = vsel %vm779_vm5, 0, %v778_v3  ;;  %v314_v32 = vsel %vm312_vm6, %v313_v63, %v311_v20  ;;  %v679_v63 = vand.u32 1, %v674_v12 }
  0xc5   :  { %v165_v44 = vsub.s32 32, %v164_v40  ;;  %v169_v48 = vsub.s32 4294967266, %v164_v40  ;;  %v166_v35 = vshll.u32 %v157_v47, %v164_v40  ;;  %v315_v51 = vclz %v314_v32  ;;  %v1127_v47 = vpop.permute.xlu2 %700 }
  0xc6   :  { %vm1139_vm12 = vcmp.eq.s32.totalorder %v679_v63, 0 }
  0xc7   :  { %v167_v49 = vshrl.u32 %v149_v42, %v165_v44  ;;  %v170_v38 = vadd.s32 127, %v169_v48  ;;  %v781_v54 = vadd.s32 4294967294, %v315_v51  ;;  %v334_v42 = vsel %vm211_vm10, %v333_v14, %v1114_v17 }
  0xc8   :  { %v336_v17 = vsel %vm1131_vm11, 0, %v334_v42 }
  0xc9   :  { %v168_v52 = vor.u32 %v167_v49, %v166_v35  ;;  %v171_v53 = vshll.u32 %v170_v38, 23  ;;  %vm782_vm7 = vcmp.lt.s32.totalorder %v781_v54, 0  ;;  %v508_v49 = vand.u32 3, %v507_v39 }
  0xca   :  { %v318_v58 = vsel %vm782_vm7, 0, %v781_v54 }
  0xcb   :  { %v172_v55 = vor.u32 4788187, %v171_v53  ;;  %v175_v13 = vcvt.s32.f32 %v168_v52  ;;  %v319_v18 = vsub.s32 32, %v318_v58  ;;  %v323_v57 = vsub.s32 4294967266, %v318_v58 }
  0xcc   :  { %v320_v41 = vshll.u32 %v311_v20, %v318_v58  ;;  %vm509_vm1 = vcmp.lt.s32.totalorder %v508_v49, 2  ;;  %vm510_vm2 = vcmp.eq.s32.totalorder %v508_v49, 0  ;;  %vm513_vm3 = vcmp.eq.s32.totalorder %v508_v49, 2 }
  0xcd   :  { %v173_v62 = vand.u32 2147483647, %v172_v55  ;;  %v321_v61 = vshrl.u32 %v303_v56, %v319_v18  ;;  %v324_v60 = vadd.s32 127, %v323_v57  ;;  %v1144_v55 = vpop.permute.xlu1 %694  ;;  %v719_v56 = vpop.permute.xlu0 %718 }
  0xce   :  { %v705_v42 = vsel %vm1139_vm12, %v1144_v55, %v1127_v47 }
  0xcf   :  { %v176_v1 = vmul.f32 %v175_v13, %v173_v62  ;;  %v322_v25 = vor.u32 %v321_v61, %v320_v41  ;;  %v325_v10 = vshll.u32 %v324_v60, 23  ;;  %v704_v60 = vsel %vm1139_vm12, %v1123_v8, %v1117_v21 }
  0xd1   :  { %v177_v23 = vxor.u32 2147483648, %v176_v1  ;;  %v326_v30 = vor.u32 4788187, %v325_v10  ;;  %v329_v26 = vcvt.s32.f32 %v322_v25  ;;  %v662_v25 = vadd.s32 3, %v336_v17 }
  0xd3   :  { %v178_v27 = vsel %vm57_vm8, %v177_v23, %v176_v1  ;;  %v327_v33 = vand.u32 2147483647, %v326_v30  ;;  %v725_v1 = vpop.permute.xlu2 %724 }
  0xd4   :  { %v181_v28 = vsel %vm56_vm9, %v965_v9, %v178_v27 }
  0xd5   :  { %v183_v31 = vmul.f32 %v181_v28, %v181_v28  ;;  %v330_v46 = vmul.f32 %v329_v26, %v327_v33  ;;  %v730_v26 = vsel %vm1139_vm12, %v719_v56, %v725_v1 }
  0xd7   :  { %v184_v34 = vmul.f32 -0.001358992, %v183_v31  ;;  %v191_v0 = vmul.f32 -0.00019511016, %v183_v31  ;;  %v331_v59 = vxor.u32 2147483648, %v330_v46 }
  0xd9   :  { %v185_v36 = vadd.f32 0.041655596, %v184_v34  ;;  %v192_v43 = vadd.f32 0.008332121, %v191_v0  ;;  %v332_v37 = vsel %vm211_vm10, %v331_v59, %v330_v46  ;;  %v353_v34 = vand.u32 3, %v336_v17 }
  0xda   :  { %v335_v24 = vsel %vm1131_vm11, %v969_v16, %v332_v37  ;;  %vm352_vm10 = vweird.f32 %v969_v16 }
  0xdb   :  { %v186_v15 = vmul.f32 %v185_v36, %v183_v31  ;;  %v193_v7 = vmul.f32 %v192_v43, %v183_v31  ;;  %v337_v40 = vmul.f32 %v335_v24, %v335_v24  ;;  %v663_v36 = vand.u32 3, %v662_v25 }
  0xdc   :  { %vm354_vm4 = vcmp.lt.s32.totalorder %v353_v34, 2  ;;  %vm355_vm5 = vcmp.eq.s32.totalorder %v353_v34, 0  ;;  %vm358_vm6 = vcmp.eq.s32.totalorder %v353_v34, 2 }
  0xdd   :  { %v187_v3 = vadd.f32 -0.4999988, %v186_v15  ;;  %v194_v20 = vadd.f32 -0.16666654, %v193_v7  ;;  %v338_v32 = vmul.f32 -0.001358992, %v337_v40  ;;  %v721_v15 = vpop.permute.xlu1 %720  ;;  %v727_v7 = vpop.permute.xlu0 %726 }
  0xde   :  { %v345_v35 = vmul.f32 -0.00019511016, %v337_v40  ;;  %vm664_vm7 = vcmp.lt.s32.totalorder %v663_v36, 2  ;;  %vm665_vm8 = vcmp.eq.s32.totalorder %v663_v36, 0  ;;  %vm668_vm9 = vcmp.eq.s32.totalorder %v663_v36, 2 }
  0xdf   :  { %v188_v44 = vmul.f32 %v187_v3, %v183_v31  ;;  %v195_v48 = vmul.f32 %v194_v20, %v183_v31  ;;  %v339_v52 = vadd.f32 0.041655596, %v338_v32 }
  0xe0   :  { %v346_v53 = vadd.f32 0.008332121, %v345_v35 }
  0xe1   :  { %v189_v38 = vadd.f32 1.0, %v188_v44  ;;  %v196_v51 = vadd.f32 1.0, %v195_v48  ;;  %v340_v13 = vmul.f32 %v339_v52, %v337_v40 }
  0xe2   :  { %v347_v18 = vmul.f32 %v346_v53, %v337_v40 }
  0xe3   :  { %v197_v58 = vmul.f32 %v196_v51, %v181_v28  ;;  %v205_v62 = vxor.u32 2147483648, %v189_v38  ;;  %v341_v41 = vadd.f32 -0.4999988, %v340_v13 }
  0xe4   :  { %v348_v23 = vadd.f32 -0.16666654, %v347_v18 }
  0xe5   :  { %v202_v57 = vxor.u32 2147483648, %v197_v58  ;;  %v206_v61 = vsel %vm204_vm0, %v205_v62, %v197_v58  ;;  %v515_v27 = vsel %vm513_vm3, %v205_v62, %v197_v58  ;;  %v342_v30 = vmul.f32 %v341_v41, %v337_v40 }
  0xe6   :  { %v349_v33 = vmul.f32 %v348_v23, %v337_v40 }
  0xe7   :  { %v203_v10 = vsel %vm201_vm15, %v189_v38, %v202_v57  ;;  %v512_v11 = vsel %vm510_vm2, %v189_v38, %v202_v57  ;;  %v343_v21 = vadd.f32 1.0, %v342_v30 }
  0xe8   :  { %v207_v28 = vsel %vm200_vm14, %v203_v10, %v206_v61  ;;  %v516_v31 = vsel %vm509_vm1, %v512_v11, %v515_v27  ;;  %v350_v8 = vadd.f32 1.0, %v349_v33 }
  0xe9   :  { %v208_v22 = vsel %vm198_vm13, nan, %v207_v28  ;;  %v517_v29 = vsel %vm198_vm13, nan, %v516_v31  ;;  %v359_v14 = vxor.u32 2147483648, %v343_v21 }
  0xea   :  { %v706_v0 = vmul.f32 %v940_v2, %v208_v22  ;;  %v708_v46 = vmul.f32 %v704_v60, %v517_v29  ;;  %v732_v50 = vmul.f32 %v954_v5, %v208_v22  ;;  %v734_v43 = vmul.f32 %v730_v26, %v517_v29 }
  0xeb   :  { %v351_v12 = vmul.f32 %v350_v8, %v335_v24  ;;  %v731_v2 = vsel %vm1139_vm12, %v721_v15, %v727_v7 }
  0xec   :  { %v710_v59 = vadd.f32 %v708_v46, %v706_v0  ;;  %v736_v45 = vadd.f32 %v734_v43, %v732_v50 }
  0xed   :  { %v356_v9 = vxor.u32 2147483648, %v351_v12  ;;  %v360_v37 = vsel %vm358_vm6, %v359_v14, %v351_v12  ;;  %v670_v24 = vsel %vm668_vm9, %v359_v14, %v351_v12 }
  0xee   :  { %712 = vst [vmem:[#allocation5] sm:$0xff] %v710_v59 }
  0xef   :  { %738 = vst [vmem:[#allocation6] sm:$0xff] %v736_v45  ;;  %v357_v5 = vsel %vm355_vm5, %v343_v21, %v356_v9  ;;  %v667_v39 = vsel %vm665_vm8, %v343_v21, %v356_v9 }
  0xf0   :  { %v361_v3 = vsel %vm354_vm4, %v357_v5, %v360_v37  ;;  %v671_v20 = vsel %vm664_vm7, %v667_v39, %v670_v24 }
  0xf1   :  { %v362_v40 = vsel %vm352_vm10, nan, %v361_v3  ;;  %v672_v63 = vsel %vm352_vm10, nan, %v671_v20 }
  0xf2   :  { %v707_v44 = vmul.f32 %v950_v4, %v362_v40  ;;  %v709_v48 = vmul.f32 %v705_v42, %v672_v63  ;;  %v733_v16 = vmul.f32 %v956_v6, %v362_v40  ;;  %v735_v32 = vmul.f32 %v731_v2, %v672_v63 }
  0xf4   :  { %v711_v35 = vadd.f32 %v709_v48, %v707_v44  ;;  %v737_v47 = vadd.f32 %v735_v32, %v733_v16 }
  0xf6   :  { %713 = vst [vmem:[#allocation5 + $0x8] sm:$0xff] %v711_v35 }
  0xf7   :  { %739 = vst [vmem:[#allocation6 + $0x8] sm:$0xff] %v737_v47  ;;  %752 = dma.vmem_to_hbm [thread:$0]  %s745_s9, 256, %s747_s12, [#allocation4], %s884_s23, %s884_s23, %s885_s24  }
  0xf8   :  { %765 = dma.vmem_to_hbm [thread:$0]  %s758_s14, 256, %s760_s17, [#allocation7], %s884_s23, %s884_s23, %s885_s24  }
  0xf9   :  { %879 = dma.done.wait [#allocation4], 256  }
  0xfa   :  { %880 = vsyncadd [#allocation4], 4294967040 }
  0xfb   :  { %881 = dma.done.wait [#allocation7], 256  }
  0xfc   :  { %882 = vsyncadd [#allocation7], 4294967040 }
  0xfd   :  { %774 = vsyncpa [#allocation3], 1 }
  0xfe   :  { %775 = vsyncpa [#allocation4], 1 }
  0xff   :  { %776 = vsyncpa [#allocation7], 1 }

</bundles_post_ra>
